<compile_context>
chip_gen: v5e
topology: v5e:2x2
jax: 0.10.0
libtpu: 0.0.40
codegen_flags: <defaults>
</compile_context>

<pallas_src>
import functools

import jax
import jax.numpy as jnp
from jax import lax
from jax.experimental import pallas as pl
from jax.experimental.pallas import tpu as pltpu

_LANE = 128
_SUBLANE = 8
_NUM_CORE_SPLITS = 2            # v7x has 2 TensorCores; harmless extra grid dim on v5e/v6e.
_TARGET_BLOCK_BYTES = 4 << 20   # ~4 MiB per logits buffer (double-buffered by Pallas).
_NEG_FILL = -1e30               # fill for padded class columns -> exp() underflows to 0


def _round_up(x, m):
    return ((x + m - 1) // m) * m


def _ce_partial_kernel(logits_ref, targets_ref, out_ref, *,
                       block_rows, blocks_per_split, batch):
    """Accumulate the sum of per-row cross entropy for this core's batch slice."""
    p = pl.program_id(0)   # core-split index   ("parallel")
    i = pl.program_id(1)   # batch-block index  ("arbitrary", carries the accumulator)

    @pl.when(i == 0)
    def _init():
        out_ref[...] = jnp.zeros_like(out_ref)

    x = logits_ref[...].astype(jnp.float32)               # (TB, CP) upcast in-kernel
    t = targets_ref[...]                                   # (TB, 1) int32
    tb, cp = x.shape

    # Stable row-wise CE, fused so the row max cancels:
    #   ce = lse(x) - x[target] = log(sum(exp(x - m))) - (x[target] - m)
    m = jnp.max(x, axis=-1, keepdims=True)                  # (TB, 1)
    z = x - m
    sum_e = jnp.sum(jnp.exp(z), axis=-1, keepdims=True)     # (TB, 1)
    col = lax.broadcasted_iota(jnp.int32, (tb, cp), 1)
    z_tgt = jnp.sum(jnp.where(col == t, z, 0.0), axis=-1, keepdims=True)
    ce = jnp.log(sum_e) - z_tgt                              # (TB, 1)

    # Mask rows that are batch padding / out-of-bounds (partial edge blocks and
    # clamped phantom blocks); also keeps unspecified OOB data out of the sum.
    row = lax.broadcasted_iota(jnp.int32, (tb, 1), 0)
    global_row = (p * blocks_per_split + i) * block_rows + row
    ce = jnp.where(global_row < batch, ce, 0.0)

    out_ref[...] += jnp.sum(ce)


def focal_loss(inputs, targets, alpha=1.0, gamma=2.0, block_rows=None):
    """inputs: (B, C) float logits; targets: (B,) integer class ids -> scalar f32 loss."""
    if inputs.ndim != 2 or targets.ndim != 1:
        raise ValueError("expected inputs of shape (B, C) and targets of shape (B,)")
    # TODO(synk): F.cross_entropy's ignore_index=-100 semantics are not implemented
    # (targets are assumed to be valid class indices), matching the module's usage.
    b, c = inputs.shape
    itemsize = jnp.dtype(inputs.dtype).itemsize

    # Pad the class axis to a multiple of 128 lanes (full-lane VPU/XLU reductions);
    # the fill value keeps padded columns out of the exp-sum and the one-hot.
    c_pad = max(_LANE, _round_up(c, _LANE))
    logits = inputs
    if c_pad != c:
        logits = jnp.pad(inputs, ((0, 0), (0, c_pad - c)),
                         constant_values=jnp.asarray(_NEG_FILL, inputs.dtype))

    targets2d = targets.astype(jnp.int32).reshape(b, 1)

    # Batch tile: ~4 MiB per buffer, multiple of 8 sublanes, capped by the batch.
    if block_rows is None:
        block_rows = _TARGET_BLOCK_BYTES // (c_pad * itemsize)
    block_rows = max(_SUBLANE, (block_rows // _SUBLANE) * _SUBLANE)
    block_rows = min(block_rows, max(_SUBLANE, (b // _SUBLANE) * _SUBLANE))

    num_blocks = pl.cdiv(b, block_rows)
    blocks_per_split = pl.cdiv(num_blocks, _NUM_CORE_SPLITS)

    def block_index(p, i):
        # Clamp phantom blocks (from rounding num_blocks up to the core split) onto
        # the last real block; their rows are fully masked inside the kernel.
        return (jnp.minimum(p * blocks_per_split + i, num_blocks - 1), 0)

    kernel = functools.partial(
        _ce_partial_kernel,
        block_rows=block_rows,
        blocks_per_split=blocks_per_split,
        batch=b,
    )

    partial_ce = pl.pallas_call(
        kernel,
        out_shape=jax.ShapeDtypeStruct((_NUM_CORE_SPLITS, 1, 1), jnp.float32),
        grid=(_NUM_CORE_SPLITS, blocks_per_split),
        in_specs=[
            pl.BlockSpec((block_rows, c_pad), block_index),
            pl.BlockSpec((block_rows, 1), block_index),
        ],
        out_specs=pl.BlockSpec((1, 1, 1), lambda p, i: (p, 0, 0)),
        compiler_params=pltpu.CompilerParams(
            dimension_semantics=("parallel", "arbitrary")),
        cost_estimate=pl.CostEstimate(
            flops=6 * b * c_pad,
            transcendentals=b * c_pad,
            bytes_accessed=b * c_pad * itemsize + b * 4 + _NUM_CORE_SPLITS * 4,
        ),
    )(logits, targets2d)

    # Scalar finalize (a handful of flops): mean over the TRUE batch + focal modulation.
    ce_mean = jnp.sum(partial_ce) / jnp.float32(b)
    pt = jnp.exp(-ce_mean)
    one_minus_pt = 1.0 - pt
    if isinstance(gamma, (int, float)) and float(gamma) == 2.0:
        modulation = one_minus_pt * one_minus_pt          # avoid float pow / EUP log-exp
    elif isinstance(gamma, int) or (isinstance(gamma, float) and float(gamma).is_integer()):
        modulation = lax.integer_pow(one_minus_pt, int(gamma))
    else:
        modulation = one_minus_pt ** gamma
    return alpha * modulation * ce_mean


def _reference(inputs, targets, alpha=1.0, gamma=2.0):
    # Plain-JAX reference mirroring the PyTorch module.
    x = inputs.astype(jnp.float32)
    lse = jax.scipy.special.logsumexp(x, axis=-1)
    tgt = jnp.take_along_axis(x, targets[:, None].astype(jnp.int32), axis=-1)[:, 0]
    ce = jnp.mean(lse - tgt)
    return alpha * (1.0 - jnp.exp(-ce)) ** gamma * ce


if __name__ == "__main__":
    key = jax.random.PRNGKey(0)
    k1, k2 = jax.random.split(key)
    B, C = 20, 40   # deliberately not multiples of 8 / 128 to exercise masking + padding
    inputs = jax.random.normal(k1, (B, C), dtype=jnp.float32)
    targets = jax.random.randint(k2, (B,), 0, C, dtype=jnp.int32)

    loss = focal_loss(inputs, targets)                       # auto-sized batch tile
    loss_small = focal_loss(inputs, targets, block_rows=8)   # multi-step pipeline path
    jax.block_until_ready((loss, loss_small))

    ref = _reference(inputs, targets)
    assert jnp.allclose(loss, ref, rtol=1e-4, atol=1e-5), (loss, ref)
    assert jnp.allclose(loss_small, ref, rtol=1e-4, atol=1e-5), (loss_small, ref)
    print("KERNEL_OK")
</pallas_src>

<mosaic_0001>
module attributes {stable_mosaic.version = 11 : i64} {
  func.func @_ce_partial_kernel(%arg0: i32, %arg1: i32, %arg2: memref<16x128xf32, #tpu.memory_space<vmem>>, %arg3: memref<16x1xi32, #tpu.memory_space<vmem>>, %arg4: memref<1x1x1xf32, #tpu.memory_space<vmem>>) attributes {dimension_semantics = [#tpu.dimension_semantics<parallel>, #tpu.dimension_semantics<arbitrary>], iteration_bounds = array<i64: 2, 1>, scalar_prefetch = 0 : i64, scratch_operands = 0 : i64, tpu.core_type = #tpu.core_type<tc>, window_params = [{transform_indices = @transform_0, window_bounds = array<i64: 16, 128>}, {transform_indices = @transform_1, window_bounds = array<i64: 16, 1>}, {transform_indices = @transform_2, window_bounds = array<i64: 1, 1, 1>}]} {
    %c0_i32 = arith.constant 0 : i32
    %0 = arith.cmpi eq, %arg1, %c0_i32 : i32
    %1 = arith.extui %0 : i1 to i32
    %c0_i32_0 = arith.constant 0 : i32
    %2 = arith.cmpi ne, %1, %c0_i32_0 : i32
    scf.if %2 {
      %cst_15 = arith.constant 0.000000e+00 : f32
      %39 = vector.broadcast %cst_15 : f32 to vector<1x1x1xf32>
      %c0_16 = arith.constant 0 : index
      %c0_17 = arith.constant 0 : index
      %c0_18 = arith.constant 0 : index
      %40 = vector.load %arg4[%c0_16, %c0_17, %c0_18] : memref<1x1x1xf32, #tpu.memory_space<vmem>>, vector<1x1x1xf32>
      tpu.vector_store %arg4[%c0_16, %c0_17, %c0_18], %39 {strides = array<i32>} : memref<1x1x1xf32, #tpu.memory_space<vmem>>, vector<1x1x1xf32>,
    } else {
    }
    %c0 = arith.constant 0 : index
    %c0_1 = arith.constant 0 : index
    %3 = vector.load %arg2[%c0, %c0_1] : memref<16x128xf32, #tpu.memory_space<vmem>>, vector<16x128xf32>
    %c0_2 = arith.constant 0 : index
    %c0_3 = arith.constant 0 : index
    %4 = vector.load %arg3[%c0_2, %c0_3] : memref<16x1xi32, #tpu.memory_space<vmem>>, vector<16x1xi32>
    %cst = arith.constant dense<0xFF800000> : vector<16xf32>
    %5 = vector.multi_reduction <maximumf>, %3, %cst [1] : vector<16x128xf32> to vector<16xf32>
    %6 = vector.shape_cast %5 : vector<16xf32> to vector<16x1xf32>
    %7 = vector.broadcast %6 : vector<16x1xf32> to vector<16x128xf32>
    %8 = arith.subf %3, %7 : vector<16x128xf32>
    %9 = math.exp %8 : vector<16x128xf32>
    %cst_4 = arith.constant dense<0.000000e+00> : vector<16xf32>
    %10 = vector.multi_reduction <add>, %9, %cst_4 [1] : vector<16x128xf32> to vector<16xf32>
    %11 = vector.shape_cast %10 : vector<16xf32> to vector<16x1xf32>
    %12 = tpu.iota {dimensions = array<i32: 1>} : vector<16x128xi32>
    %13 = vector.broadcast %4 : vector<16x1xi32> to vector<16x128xi32>
    %14 = arith.cmpi eq, %12, %13 : vector<16x128xi32>
    %cst_5 = arith.constant 0.000000e+00 : f32
    %15 = vector.broadcast %cst_5 : f32 to vector<16x128xf32>
    %16 = arith.select %14, %8, %15 : vector<16x128xi1>, vector<16x128xf32>
    %cst_6 = arith.constant dense<0.000000e+00> : vector<16xf32>
    %17 = vector.multi_reduction <add>, %16, %cst_6 [1] : vector<16x128xf32> to vector<16xf32>
    %18 = vector.shape_cast %17 : vector<16xf32> to vector<16x1xf32>
    %19 = math.log %11 : vector<16x1xf32>
    %20 = arith.subf %19, %18 : vector<16x1xf32>
    %21 = tpu.iota {dimensions = array<i32: 0>} : vector<16x1xi32>
    %c1_i32 = arith.constant 1 : i32
    %22 = arith.muli %arg0, %c1_i32 : i32
    %23 = arith.addi %22, %arg1 : i32
    %c16_i32 = arith.constant 16 : i32
    %24 = arith.muli %23, %c16_i32 : i32
    %25 = vector.broadcast %24 : i32 to vector<16x1xi32>
    %26 = arith.addi %25, %21 : vector<16x1xi32>
    %c20_i32 = arith.constant 20 : i32
    %27 = vector.broadcast %c20_i32 : i32 to vector<16x1xi32>
    %28 = arith.cmpi slt, %26, %27 : vector<16x1xi32>
    %cst_7 = arith.constant 0.000000e+00 : f32
    %29 = vector.broadcast %cst_7 : f32 to vector<16x1xf32>
    %30 = arith.select %28, %20, %29 : vector<16x1xi1>, vector<16x1xf32>
    %c0_8 = arith.constant 0 : index
    %c0_9 = arith.constant 0 : index
    %c0_10 = arith.constant 0 : index
    %31 = vector.load %arg4[%c0_8, %c0_9, %c0_10] : memref<1x1x1xf32, #tpu.memory_space<vmem>>, vector<1x1x1xf32>
    %32 = vector.shape_cast %30 : vector<16x1xf32> to vector<1x16x1xf32>
    %cst_11 = arith.constant dense<0.000000e+00> : vector<1xf32>
    %33 = vector.multi_reduction <add>, %32, %cst_11 [1, 2] : vector<1x16x1xf32> to vector<1xf32>
    %34 = vector.shape_cast %33 : vector<1xf32> to vector<1x1x1xf32>
    %35 = vector.extract %34[0, 0, 0] : f32 from vector<1x1x1xf32>
    %36 = vector.broadcast %35 : f32 to vector<1x1x1xf32>
    %37 = arith.addf %31, %36 : vector<1x1x1xf32>
    %c0_12 = arith.constant 0 : index
    %c0_13 = arith.constant 0 : index
    %c0_14 = arith.constant 0 : index
    %38 = vector.load %arg4[%c0_12, %c0_13, %c0_14] : memref<1x1x1xf32, #tpu.memory_space<vmem>>, vector<1x1x1xf32>
    tpu.vector_store %arg4[%c0_12, %c0_13, %c0_14], %37 {strides = array<i32>} : memref<1x1x1xf32, #tpu.memory_space<vmem>>, vector<1x1x1xf32>,
    return
  }
  func.func @transform_0(%arg0: i32, %arg1: i32) -> (i32, i32) {
    %c1_i32 = arith.constant 1 : i32
    %0 = arith.muli %arg0, %c1_i32 : i32
    %1 = arith.addi %0, %arg1 : i32
    %c1_i32_0 = arith.constant 1 : i32
    %2 = arith.minsi %1, %c1_i32_0 : i32
    %c0_i32 = arith.constant 0 : i32
    %c0_i32_1 = arith.constant 0 : i32
    return %2, %c0_i32 : i32, i32
  }
  func.func @transform_1(%arg0: i32, %arg1: i32) -> (i32, i32) {
    %c1_i32 = arith.constant 1 : i32
    %0 = arith.muli %arg0, %c1_i32 : i32
    %1 = arith.addi %0, %arg1 : i32
    %c1_i32_0 = arith.constant 1 : i32
    %2 = arith.minsi %1, %c1_i32_0 : i32
    %c0_i32 = arith.constant 0 : i32
    %c0_i32_1 = arith.constant 0 : i32
    return %2, %c0_i32 : i32, i32
  }
  func.func @transform_2(%arg0: i32, %arg1: i32) -> (i32, i32, i32) {
    %c0_i32 = arith.constant 0 : i32
    %c0_i32_0 = arith.constant 0 : i32
    %c0_i32_1 = arith.constant 0 : i32
    return %arg0, %c0_i32, %c0_i32_0 : i32, i32, i32
  }
}

</mosaic_0001>

<bundles_post_ra>
// kernel: tpu_custom_call.1
= control target key start
LH: loop header
LB: loop body
LE: loop exit
PB: predicated region body
PF: predicated region fallthrough
CT: control target
= control target key end

     0   :  { %s492_s9 = smov 0   ;;  %s494_s10 = smov 0   ;;  %s537_s0 = inlined_call_operand.vmem [shape: f32[20,128], index: 0, kind: input, shape index: {}]   ;;  %s538_s1 = inlined_call_operand.vmem [shape: s32[20,1], index: 1, kind: input, shape index: {}]   ;;  %s539_s2 = inlined_call_operand.vmem [shape: f32[2,1,1], index: 2, kind: output, shape index: {}]  }
   0x1   :  { %s496_s11 = smov 0  }
   0x2 LB: > { %s24_s12 = sadd.s32 1, %s469_s10  ;;  %p405_p0 = scmp.ge.s32.totalorder %s473_s11, 1  ;;  %s473_s11 = sphi %s496_s11, %s12_s11   ;;  %s469_s10 = sphi %s494_s10, %s541_s10   ;;  %s465_s9 = sphi %s492_s9, %s540_s9  }
   0x3   : > { %p26_p1 = scmp.ge.s32.totalorder %s24_s12, 2  ;;  %p176_p2 = scmp.lt.s32.totalorder %s473_s11, 3 }
   0x5   : > { %s543_s12 = smov (%p26_p1, %s24_s12), 0  ;;  %p177_p3 = pnand %p405_p0, %p176_p2 }
   0x6   : > { %p216_p4 = scmp.lt.s32.totalorder (!%p177_p3), %s465_s9, 1  ;;  %s410_s22 = sshll.u32 (!%p177_p3), %s465_s9, 4 }
   0x7   : > { %180 = sbr.rel (%p177_p3) target bundleno = 469 (0x1d5), region = 28 }
   0xc   : > { %v475_v0 = vmov 0   ;;  %s514_s13 = scalar_select %p216_p4, %s465_s9, 1  ;;  %v282_v5 = vlaneseq  ;;  %v309_v23 = vstv %s410_s22  ;;  %vm317_vm4 = vcmask 7168  }
   0xd   : > { %441 = vset.pattern.permute.xlu1 %v475_v0  ;;  %442 = vset.pattern.permute.xlu0 %v475_v0  ;;  %vm262_vm5 = vcmask 0   ;;  %v476_v39 = vmov 0.0  }
   0xe   : > { %s406_s14 = sshll.u32 %s514_s13, 1  ;;  %v283_v6 = vand.u32 127, %v282_v5  ;;  %v305_v21 = vshrl.u32 %v282_v5, 7  ;;  %s257_s25 = scalar_lea.vmem %s539_s2, %s514_s13 }
   0xf   : > { %p223_p5 = scmp.lt.s32.totalorder %s406_s14, 2  ;;  %263 = vst.msk [vmem:[%s257_s25] sm:$0x1] %vm262_vm5, %v476_v39 }
  0x10   : > { %v306_v24 = vadd.s32 8, %v305_v21  ;;  %v310_v26 = vadd.s32 %v309_v23, %v305_v21 }
  0x11   : > { %s545_s14 = smov (!%p223_p5, %s406_s14), 2 }
  0x12   : > { %s407_s15 = sshll.u32 %s545_s14, 3  ;;  %v311_v28 = vadd.s32 %v309_v23, %v306_v24  ;;  %vm312_vm2 = vcmp.lt.s32.totalorder %v310_v26, 20 }
  0x13   : > { %s226_s18 = scalar_lea.vmem %s537_s0, %s407_s15  ;;  %s246_s21 = scalar_lea.vmem %s538_s1, %s407_s15 }
  0x14   : > { %v264_v1 = vld [vmem:[%s226_s18] sm:$0xff]  ;;  %v265_v3 = vld [vmem:[%s226_s18 + $0x8] sm:$0xff]  ;;  %vm313_vm3 = vcmp.lt.s32.totalorder %v311_v28, 20 }
  0x15   : > { %v266_v2 = vld [vmem:[%s246_s21] sm:$0xff]  ;;  %268 = vmax.xlane.f32.xlu0 %v264_v1  ;;  %v267_v4 = vld [vmem:[%s246_s21 + $0x8] sm:$0xff] }
  0x16   : > { %285 = vperm.xlu1 %441, %v266_v2   ;;  %v316_v47 = vld [vmem:[%s257_s25] sm:$0x1] }
  0x1d   : > { %270 = vmax.xlane.f32.xlu0 %v265_v3 }
  0x1e   : > { %288 = vperm.xlu1 %441, %v267_v4  }
  0x88   : > { %v286_v7 = vpop.permute.xlu1 %285  ;;  %v269_v8 = vpop.xlane.xlu0 %268 }
  0x89   : > { %vm290_vm0 = vcmp.eq.s32.totalorder %v283_v6, %v286_v7  ;;  %v272_v9 = vsub.f32 %v264_v1, %v269_v8 }
  0x8b   : > { %v292_v10 = vsel %vm290_vm0, %v272_v9, 0.0  ;;  %v274_v11 = vmul.f32 1.442695, %v272_v9 }
  0x8c   : > { %294 = vadd.xlane.f32.xlu0 %v292_v10 }
  0x8d   : > { %443 = vpow2.f32 %v274_v11 }
  0x90   : > { %v289_v12 = vpop.permute.xlu1 %288  ;;  %v271_v13 = vpop.xlane.xlu0 %270 }
  0x91   : > { %vm291_vm1 = vcmp.eq.s32.totalorder %v283_v6, %v289_v12  ;;  %v273_v14 = vsub.f32 %v265_v3, %v271_v13 }
  0x93   : > { %v444_v15 = vpop.eup %443  ;;  %v276_v16 = vmul.f32 1.442695, %v273_v14  ;;  %v293_v17 = vsel %vm291_vm1, %v273_v14, 0.0 }
  0x94   : > { %278 = vadd.xlane.f32.xlu2 %v444_v15  ;;  %296 = vadd.xlane.f32.xlu1 %v293_v17 }
  0x95   : > { %445 = vpow2.f32 %v276_v16 }
  0x9b   : > { %v446_v18 = vpop.eup %445 }
  0x9c   : > { %280 = vadd.xlane.f32.xlu2 %v446_v18 }
  0xff   : > { %v295_v27 = vpop.xlane.xlu0 %294 }
 0x107   : > { %v279_v19 = vpop.xlane.xlu2 %278  ;;  %v297_v32 = vpop.xlane.xlu1 %296 }
 0x108   : > { %447 = vlog2.f32 %v279_v19 }
 0x10e   : > { %v448_v20 = vpop.eup %447 }
 0x10f   : > { %v281_v22 = vpop.xlane.xlu2 %280  ;;  %v299_v25 = vmul.f32 0.6931472, %v448_v20 }
 0x110   : > { %449 = vlog2.f32 %v281_v22 }
 0x111   : > { %v302_v29 = vsub.f32 %v299_v25, %v295_v27 }
 0x113   : > { %v314_v34 = vsel %vm312_vm2, %v302_v29, 0.0 }
 0x114   : > { %v318_v36 = vsel %vm317_vm4, %v314_v34, 0.0 }
 0x116   : > { %v450_v30 = vpop.eup %449 }
 0x117   : > { %v301_v31 = vmul.f32 0.6931472, %v450_v30 }
 0x119   : > { %v303_v33 = vsub.f32 %v301_v31, %v297_v32 }
 0x11b   : > { %v315_v35 = vsel %vm313_vm3, %v303_v33, 0.0 }
 0x11c   : > { %v319_v37 = vsel %vm317_vm4, %v315_v35, 0.0 }
 0x11d   : > { %v320_v38 = vadd.f32 %v319_v37, %v318_v36 }
 0x11f   : > { %321 = vadd.xlane.f32.xlu2 %v320_v38 }
 0x192   : > { %v322_v40 = vpop.xlane.xlu2 %321 }
 0x193   : > { %v323_v41 = vrot.slane %v322_v40, 4 }
 0x195   : > { %v324_v42 = vadd.f32 %v323_v41, %v322_v40 }
 0x197   : > { %v325_v43 = vrot.slane %v324_v42, 2 }
 0x199   : > { %v326_v44 = vadd.f32 %v325_v43, %v324_v42 }
 0x19b   : > { %v327_v45 = vrot.slane %v326_v44, 1 }
 0x19d   : > { %v328_v46 = vadd.f32 %v327_v45, %v326_v44 }
 0x19f   : > { %413 = vpush %v328_v46 }
 0x1d0   : > { %s414_s26 = spop %413 }
 0x1d1   : > { %v330_v48 = vstv %s414_s26 }
 0x1d2   : > { %v331_v49 = vadd.f32 %v330_v48, %v316_v47 }
 0x1d4   : > { %333 = vst.msk [vmem:[%s257_s25] sm:$0x1] %vm262_vm5, %v331_v49 }
 0x1d5 PF: > { %s12_s11 = sadd.s32 1, %s473_s11   ;;  %s540_s9 = smov %s469_s10 }
 0x1d6   : > { %p9_p6 = scmp.ge.s32.totalorder %s12_s11, 4   ;;  %s541_s10 = smov %s543_s12 }
 0x1d8   :  { %11 = sbr.rel (!%p9_p6) target bundleno = 2 (0x2), region = 65 }

</bundles_post_ra>
